<compile_context>
chip_gen: v7x
topology: tpu7x:2x2x1
jax: 0.10.0
libtpu: 0.0.40
codegen_flags: <defaults>
</compile_context>

<pallas_src>
import math

import jax
import jax.numpy as jnp
from jax import lax
from jax.experimental import pallas as pl
from jax.experimental.pallas import tpu as pltpu


_LANES = 128
_SUB_ROWS = 8          # inner sub-chunk: 8 rows x 128 lanes = 1024 samples


def _device_kind():
    try:
        return jax.devices()[0].device_kind.lower()
    except Exception:
        return ""


def _default_exp_dtype():
    """bf16 arithmetic/exp on chips with bf16 VALU+EUP (v6e / v7x); f32 elsewhere."""
    kind = _device_kind()
    if ("v6" in kind) or ("v7" in kind) or ("7x" in kind):
        return jnp.bfloat16
    return jnp.float32


def _default_num_partials():
    """Multiple of 2 so the 'parallel' leading grid axis shards across both v7x
    TensorCores; 4 on v7x gives each TC two independent accumulation streams."""
    kind = _device_kind()
    if ("v7" in kind) or ("7x" in kind):
        return 4
    return 2


def _make_kernel(*, tile_rows, bins_p, c0, c1, x_mid, x_scale, exp_dtype,
                 n_chains, unroll):
    """Build the histogram kernel.

    Scaled coords: x_s = (x - x_mid)*x_scale, c_s[b] = c0 + c1*b, with
    x_scale = sqrt(0.5)/sigma so that exp(-(x_s - c_s)^2) == exp(-0.5*((x-c)/sigma)^2).
    """
    n_sub = tile_rows // _SUB_ROWS

    def kernel(x_ref, o_ref):
        # x_ref: (tile_rows, 128)  samples, lane-dense (tail padded with +inf)
        # o_ref: (bins_p, 128)     per-lane partial sums; resident across grid axis 1
        i = pl.program_id(1)

        @pl.when(i == 0)
        def _():
            o_ref[...] = jnp.zeros_like(o_ref)

        # Scaled bin centers rebuilt from an iota (tiny, once per grid step) --
        # no resident centers input / pipeline bookkeeping needed.
        bi = lax.broadcasted_iota(jnp.int32, (bins_p, _LANES), 0).astype(jnp.float32)
        cs_e = (c0 + c1 * bi).astype(exp_dtype)              # (bins_p, 128)

        def sub_body(c, carry):
            r0 = pl.multiple_of(c * _SUB_ROWS, _SUB_ROWS)
            # Whole sub/mul/neg/exp pipeline in exp_dtype (bf16 on v6e/v7x);
            # samples cast once per 8-row sub-chunk.  +inf padding flows through
            # to exp(-inf) == 0, so no tail masking is needed.
            xb = ((x_ref[pl.ds(r0, _SUB_ROWS), :] - x_mid) * x_scale).astype(exp_dtype)
            accs = list(carry)
            for rr in range(_SUB_ROWS):                      # static row extract
                xr = xb[rr:rr + 1, :]                        # (1, 128)
                d = xr - cs_e                                # (bins_p, 128)
                w = jnp.exp(-(d * d))
                k = rr % n_chains
                accs[k] = accs[k] + w.astype(jnp.float32)    # f32 accumulate only
            return tuple(accs)

        acc0 = o_ref[...]
        init = (acc0,) + tuple(jnp.zeros_like(acc0) for _ in range(n_chains - 1))
        accs = lax.fori_loop(0, n_sub, sub_body, init, unroll=unroll)
        out = accs[0]
        for a in accs[1:]:
            out = out + a
        o_ref[...] = out

    return kernel


def gaussian_histogram(x, bins, vmin, vmax, sigma, *,
                       tile_n=32768, num_partials=None, exp_dtype=None):
    """Pallas TPU implementation of GaussianHistogram.forward.

    x: array of samples (flattened). Returns f32 array of shape (bins,).
    """
    if exp_dtype is None:
        exp_dtype = _default_exp_dtype()
    if num_partials is None:
        num_partials = _default_num_partials()

    assert tile_n % (_SUB_ROWS * _LANES) == 0, "tile_n must be a multiple of 1024"
    tile_rows_req = tile_n // _LANES

    x = jnp.asarray(x, dtype=jnp.float32).reshape(-1)
    n = int(x.shape[0])
    assert n > 0

    delta = float(vmax - vmin) / float(bins)
    scale = delta / (float(sigma) * math.sqrt(2.0 * math.pi))
    x_scale = math.sqrt(0.5) / float(sigma)       # folds the 0.5 and 1/sigma together
    x_mid = 0.5 * (float(vmin) + float(vmax))     # centre scaled coords (bf16 accuracy)

    bins_p = ((bins + 7) // 8) * 8                # sublane-pad bins to a multiple of 8
    # Scaled centers generated in-kernel: c_s[b] = c0 + c1*b  (padded bins > `bins`
    # are computed then discarded -- correct, just a little wasted work).
    c0 = (float(vmin) + 0.5 * delta - x_mid) * x_scale
    c1 = delta * x_scale

    P = max(1, int(num_partials))
    rows = pl.cdiv(n, _LANES)
    # Shrink the tile for small N so each partial still gets >= 1 real tile.
    tile_rows = min(tile_rows_req, pl.cdiv(pl.cdiv(rows, P), _SUB_ROWS) * _SUB_ROWS)
    super_rows = tile_rows * P
    rows_padded = pl.cdiv(rows, super_rows) * super_rows
    pad = rows_padded * _LANES - n
    if pad:
        # +inf padding -> exp(-inf) == 0 exactly; no in-kernel tail mask required.
        x = jnp.pad(x, (0, pad), constant_values=jnp.inf)
    x2 = x.reshape(rows_padded, _LANES)           # samples on lanes

    steps_per_partial = rows_padded // super_rows
    grid = (P, steps_per_partial)

    n_sub = tile_rows // _SUB_ROWS
    unroll = True if n_sub <= 4 else 4            # bound code size / vreg pressure
    n_chains = 2 if bins_p <= 16 else 1           # break f32 add RAW chain at tiny bins

    kernel = _make_kernel(tile_rows=tile_rows, bins_p=bins_p, c0=c0, c1=c1,
                          x_mid=x_mid, x_scale=x_scale, exp_dtype=exp_dtype,
                          n_chains=n_chains, unroll=unroll)

    partials = pl.pallas_call(
        kernel,
        out_shape=jax.ShapeDtypeStruct((P * bins_p, _LANES), jnp.float32),
        grid_spec=pltpu.PrefetchScalarGridSpec(
            num_scalar_prefetch=0,
            grid=grid,
            in_specs=[
                pl.BlockSpec((tile_rows, _LANES),
                             lambda p, i: (p * steps_per_partial + i, 0)),
            ],
            out_specs=pl.BlockSpec((bins_p, _LANES), lambda p, i: (p, 0)),
        ),
        compiler_params=pltpu.CompilerParams(
            dimension_semantics=("parallel", "arbitrary"),
        ),
    )(x2)

    # Tiny deferred reduction over parallel partials + lanes; scale applied once.
    # TODO(synk): could fold this lane reduce into the final grid step under
    # pl.when(i == steps-1); only worth a few microseconds for small outputs.
    hist = partials.reshape(P, bins_p, _LANES).sum(axis=(0, 2))[:bins] * scale
    return hist


def gaussian_histogram_ref(x, bins, vmin, vmax, sigma):
    """Pure-JAX reference mirroring the PyTorch forward exactly."""
    delta = float(vmax - vmin) / float(bins)
    centers = float(vmin) + delta * (jnp.arange(bins, dtype=jnp.float32) + 0.5)
    d = x[None, :] - centers[:, None]                      # (bins, N)
    w = jnp.exp(-0.5 * (d / sigma) ** 2) / (sigma * jnp.sqrt(jnp.pi * 2)) * delta
    return w.sum(axis=1)                                   # (bins,)


if __name__ == "__main__":
    key = jax.random.PRNGKey(0)
    k1, k2 = jax.random.split(key)

    vmin, vmax = 0.0, 1.0
    sigma = 0.05

    # 1) Small, non-tile-aligned N (exercises +inf padding), bins=32, f32 path.
    x_small = jax.random.uniform(k1, (300,), dtype=jnp.float32,
                                 minval=vmin, maxval=vmax)
    ref_small = gaussian_histogram_ref(x_small, 32, vmin, vmax, sigma)
    out_small = jax.block_until_ready(
        gaussian_histogram(x_small, 32, vmin, vmax, sigma, exp_dtype=jnp.float32))
    assert out_small.shape == (32,)
    assert jnp.allclose(out_small, ref_small, atol=1e-4, rtol=1e-4), (out_small, ref_small)

    # 2) Tiny bins (bins_p <= 16) exercises the split-accumulator-chain path.
    ref8 = gaussian_histogram_ref(x_small, 8, vmin, vmax, sigma)
    out8 = jax.block_until_ready(
        gaussian_histogram(x_small, 8, vmin, vmax, sigma, exp_dtype=jnp.float32))
    assert out8.shape == (8,)
    assert jnp.allclose(out8, ref8, atol=1e-4, rtol=1e-4), (out8, ref8)

    # 3) Larger N: multiple grid steps per partial + resident accumulation.
    x_big = jax.random.uniform(k2, (70000,), dtype=jnp.float32,
                               minval=vmin, maxval=vmax)
    ref_big = gaussian_histogram_ref(x_big, 32, vmin, vmax, sigma)
    out_big = jax.block_until_ready(
        gaussian_histogram(x_big, 32, vmin, vmax, sigma, exp_dtype=jnp.float32))
    assert out_big.shape == (32,)
    assert jnp.allclose(out_big, ref_big, atol=1e-2, rtol=1e-3), (out_big, ref_big)

    # 4) Auto path: bf16 arithmetic on v6e/v7x (looser tolerance), f32 elsewhere.
    out_auto = jax.block_until_ready(
        gaussian_histogram(x_small, 32, vmin, vmax, sigma))
    assert out_auto.shape == (32,)
    assert jnp.allclose(out_auto, ref_small, atol=0.25, rtol=5e-2), (out_auto, ref_small)

    print("KERNEL_OK")
</pallas_src>

<mosaic_0001>
module attributes {stable_mosaic.version = 11 : i64} {
  func.func @kernel(%arg0: i32, %arg1: i32, %arg2: memref<8x128xf32, #tpu.memory_space<vmem>>, %arg3: memref<32x128xf32, #tpu.memory_space<vmem>>) attributes {dimension_semantics = [#tpu.dimension_semantics<parallel>, #tpu.dimension_semantics<arbitrary>], iteration_bounds = array<i64: 2, 1>, scalar_prefetch = 0 : i64, scratch_operands = 0 : i64, tpu.core_type = #tpu.core_type<tc>, window_params = [{transform_indices = @transform_0, window_bounds = array<i64: 8, 128>}, {transform_indices = @transform_1, window_bounds = array<i64: 32, 128>}]} {
    %c0_i32 = arith.constant 0 : i32
    %0 = arith.cmpi eq, %arg1, %c0_i32 : i32
    %1 = arith.extui %0 : i1 to i32
    %c0_i32_0 = arith.constant 0 : i32
    %2 = arith.cmpi ne, %1, %c0_i32_0 : i32
    scf.if %2 {
      %cst_17 = arith.constant 0.000000e+00 : f32
      %83 = vector.broadcast %cst_17 : f32 to vector<32x128xf32>
      %c0_18 = arith.constant 0 : index
      %c0_19 = arith.constant 0 : index
      %84 = vector.load %arg3[%c0_18, %c0_19] : memref<32x128xf32, #tpu.memory_space<vmem>>, vector<32x128xf32>
      tpu.vector_store %arg3[%c0_18, %c0_19], %83 {strides = array<i32>} : memref<32x128xf32, #tpu.memory_space<vmem>>, vector<32x128xf32>,
    } else {
    }
    %3 = tpu.iota {dimensions = array<i32: 0>} : vector<32x128xi32>
    %4 = arith.sitofp %3 : vector<32x128xi32> to vector<32x128xf32>
    %cst = arith.constant 0.441941738 : f32
    %5 = vector.broadcast %cst : f32 to vector<32x128xf32>
    %6 = arith.mulf %5, %4 : vector<32x128xf32>
    %cst_1 = arith.constant -6.85009718 : f32
    %7 = vector.broadcast %cst_1 : f32 to vector<32x128xf32>
    %8 = arith.addf %7, %6 : vector<32x128xf32>
    %c0 = arith.constant 0 : index
    %c0_2 = arith.constant 0 : index
    %9 = vector.load %arg3[%c0, %c0_2] : memref<32x128xf32, #tpu.memory_space<vmem>>, vector<32x128xf32>
    %c0_i32_3 = arith.constant 0 : i32
    %c8_i32 = arith.constant 8 : i32
    %10 = arith.muli %c0_i32_3, %c8_i32 : i32
    %11 = tpu.assume_multiple %10, 8 : i32
    %12 = arith.index_cast %11 : i32 to index
    %c0_4 = arith.constant 0 : index
    %13 = vector.load %arg2[%12, %c0_4] : memref<8x128xf32, #tpu.memory_space<vmem>>, vector<8x128xf32>
    %cst_5 = arith.constant 5.000000e-01 : f32
    %14 = vector.broadcast %cst_5 : f32 to vector<8x128xf32>
    %15 = arith.subf %13, %14 : vector<8x128xf32>
    %cst_6 = arith.constant 14.1421356 : f32
    %16 = vector.broadcast %cst_6 : f32 to vector<8x128xf32>
    %17 = arith.mulf %15, %16 : vector<8x128xf32>
    %18 = vector.extract_strided_slice %17 {offsets = [0, 0], sizes = [1, 128], strides = [1, 1]} : vector<8x128xf32> to vector<1x128xf32>
    %19 = vector.broadcast %18 : vector<1x128xf32> to vector<32x128xf32>
    %20 = arith.subf %19, %8 : vector<32x128xf32>
    %21 = arith.mulf %20, %20 : vector<32x128xf32>
    %cst_7 = arith.constant 0.000000e+00 : f32
    %22 = vector.broadcast %cst_7 : f32 to vector<32x128xf32>
    %23 = arith.subf %22, %21 : vector<32x128xf32>
    %24 = math.exp %23 : vector<32x128xf32>
    %25 = arith.addf %9, %24 : vector<32x128xf32>
    %26 = vector.extract_strided_slice %17 {offsets = [1, 0], sizes = [1, 128], strides = [1, 1]} : vector<8x128xf32> to vector<1x128xf32>
    %27 = vector.broadcast %26 : vector<1x128xf32> to vector<32x128xf32>
    %28 = arith.subf %27, %8 : vector<32x128xf32>
    %29 = arith.mulf %28, %28 : vector<32x128xf32>
    %cst_8 = arith.constant 0.000000e+00 : f32
    %30 = vector.broadcast %cst_8 : f32 to vector<32x128xf32>
    %31 = arith.subf %30, %29 : vector<32x128xf32>
    %32 = math.exp %31 : vector<32x128xf32>
    %33 = arith.addf %25, %32 : vector<32x128xf32>
    %34 = vector.extract_strided_slice %17 {offsets = [2, 0], sizes = [1, 128], strides = [1, 1]} : vector<8x128xf32> to vector<1x128xf32>
    %35 = vector.broadcast %34 : vector<1x128xf32> to vector<32x128xf32>
    %36 = arith.subf %35, %8 : vector<32x128xf32>
    %37 = arith.mulf %36, %36 : vector<32x128xf32>
    %cst_9 = arith.constant 0.000000e+00 : f32
    %38 = vector.broadcast %cst_9 : f32 to vector<32x128xf32>
    %39 = arith.subf %38, %37 : vector<32x128xf32>
    %40 = math.exp %39 : vector<32x128xf32>
    %41 = arith.addf %33, %40 : vector<32x128xf32>
    %42 = vector.extract_strided_slice %17 {offsets = [3, 0], sizes = [1, 128], strides = [1, 1]} : vector<8x128xf32> to vector<1x128xf32>
    %43 = vector.broadcast %42 : vector<1x128xf32> to vector<32x128xf32>
    %44 = arith.subf %43, %8 : vector<32x128xf32>
    %45 = arith.mulf %44, %44 : vector<32x128xf32>
    %cst_10 = arith.constant 0.000000e+00 : f32
    %46 = vector.broadcast %cst_10 : f32 to vector<32x128xf32>
    %47 = arith.subf %46, %45 : vector<32x128xf32>
    %48 = math.exp %47 : vector<32x128xf32>
    %49 = arith.addf %41, %48 : vector<32x128xf32>
    %50 = vector.extract_strided_slice %17 {offsets = [4, 0], sizes = [1, 128], strides = [1, 1]} : vector<8x128xf32> to vector<1x128xf32>
    %51 = vector.broadcast %50 : vector<1x128xf32> to vector<32x128xf32>
    %52 = arith.subf %51, %8 : vector<32x128xf32>
    %53 = arith.mulf %52, %52 : vector<32x128xf32>
    %cst_11 = arith.constant 0.000000e+00 : f32
    %54 = vector.broadcast %cst_11 : f32 to vector<32x128xf32>
    %55 = arith.subf %54, %53 : vector<32x128xf32>
    %56 = math.exp %55 : vector<32x128xf32>
    %57 = arith.addf %49, %56 : vector<32x128xf32>
    %58 = vector.extract_strided_slice %17 {offsets = [5, 0], sizes = [1, 128], strides = [1, 1]} : vector<8x128xf32> to vector<1x128xf32>
    %59 = vector.broadcast %58 : vector<1x128xf32> to vector<32x128xf32>
    %60 = arith.subf %59, %8 : vector<32x128xf32>
    %61 = arith.mulf %60, %60 : vector<32x128xf32>
    %cst_12 = arith.constant 0.000000e+00 : f32
    %62 = vector.broadcast %cst_12 : f32 to vector<32x128xf32>
    %63 = arith.subf %62, %61 : vector<32x128xf32>
    %64 = math.exp %63 : vector<32x128xf32>
    %65 = arith.addf %57, %64 : vector<32x128xf32>
    %66 = vector.extract_strided_slice %17 {offsets = [6, 0], sizes = [1, 128], strides = [1, 1]} : vector<8x128xf32> to vector<1x128xf32>
    %67 = vector.broadcast %66 : vector<1x128xf32> to vector<32x128xf32>
    %68 = arith.subf %67, %8 : vector<32x128xf32>
    %69 = arith.mulf %68, %68 : vector<32x128xf32>
    %cst_13 = arith.constant 0.000000e+00 : f32
    %70 = vector.broadcast %cst_13 : f32 to vector<32x128xf32>
    %71 = arith.subf %70, %69 : vector<32x128xf32>
    %72 = math.exp %71 : vector<32x128xf32>
    %73 = arith.addf %65, %72 : vector<32x128xf32>
    %74 = vector.extract_strided_slice %17 {offsets = [7, 0], sizes = [1, 128], strides = [1, 1]} : vector<8x128xf32> to vector<1x128xf32>
    %75 = vector.broadcast %74 : vector<1x128xf32> to vector<32x128xf32>
    %76 = arith.subf %75, %8 : vector<32x128xf32>
    %77 = arith.mulf %76, %76 : vector<32x128xf32>
    %cst_14 = arith.constant 0.000000e+00 : f32
    %78 = vector.broadcast %cst_14 : f32 to vector<32x128xf32>
    %79 = arith.subf %78, %77 : vector<32x128xf32>
    %80 = math.exp %79 : vector<32x128xf32>
    %81 = arith.addf %73, %80 : vector<32x128xf32>
    %c1_i32 = arith.constant 1 : i32
    %c0_15 = arith.constant 0 : index
    %c0_16 = arith.constant 0 : index
    %82 = vector.load %arg3[%c0_15, %c0_16] : memref<32x128xf32, #tpu.memory_space<vmem>>, vector<32x128xf32>
    tpu.vector_store %arg3[%c0_15, %c0_16], %81 {strides = array<i32>} : memref<32x128xf32, #tpu.memory_space<vmem>>, vector<32x128xf32>,
    return
  }
  func.func @transform_0(%arg0: i32, %arg1: i32) -> (i32, i32) {
    %c1_i32 = arith.constant 1 : i32
    %0 = arith.muli %arg0, %c1_i32 : i32
    %1 = arith.addi %0, %arg1 : i32
    %c0_i32 = arith.constant 0 : i32
    %c0_i32_0 = arith.constant 0 : i32
    return %1, %c0_i32 : i32, i32
  }
  func.func @transform_1(%arg0: i32, %arg1: i32) -> (i32, i32) {
    %c0_i32 = arith.constant 0 : i32
    %c0_i32_0 = arith.constant 0 : i32
    return %arg0, %c0_i32 : i32, i32
  }
}

</mosaic_0001>

<bundles_post_ra>
// kernel: tpu_custom_call.1
= control target key start
LH: loop header
LB: loop body
LE: loop exit
PB: predicated region body
PF: predicated region fallthrough
CT: control target
= control target key end

     0   :  { %6 = vsyncpa [#allocation3], 0  ;;  %s1028_s0 = inlined_call_operand.hbm [shape: f32[16,128], index: 0, kind: input, shape index: {}]   ;;  %s1029_s1 = inlined_call_operand.hbm [shape: f32[64,128], index: 1, kind: output, shape index: {}]  }
   0x1   :  { %8 = vsyncpa [#allocation3 + $0x1], 0 }
   0x2   :  { %9 = vsyncpa [#allocation4], 0 }
   0x3   :  { %11 = vsyncpa [#allocation4 + $0x1], 0  ;;  %s778_s6 = smov 0   ;;  %s780_s7 = smov 0  }
   0x4   :  { %s782_s8 = smov 0   ;;  %s784_s9 = smov 0  }
   0x5   :  { %s786_s10 = smov 0   ;;  %s788_s11 = smov 0  }
   0x6 LB: > { %s505_s12 = sadd.s32 4294967295, %s762_s11   ;;  %s506_s13 = sadd.s32 4294967294, %s762_s11   ;;  %s762_s11 = sphi %s788_s11, %s17_s11   ;;  %s758_s10 = sphi %s786_s10, %s1045_s10   ;;  %s754_s9 = sphi %s784_s9, %s1044_s9   ;;  %s750_s8 = sphi %s782_s8, %s1043_s8   ;;  %s746_s7 = sphi %s780_s7, %s1042_s7   ;;  %s742_s6 = sphi %s778_s6, %s1041_s6  }
   0x7   : > { %s29_s14 = sadd.s32 1, %s758_s10  ;;  %s38_s15 = sadd.s32 1, %s750_s8 }
   0x8   : > { %p31_p0 = scmp.ge.s32.totalorder %s29_s14, 2  ;;  %p45_p1 = scmp.ne.s32.totalorder %s750_s8, %s746_s7 }
   0x9   : > { %p46_p2 = scmp.eq.s32.totalorder %s762_s11, 0  ;;  %p51_p3 = scmp.ne.s32.totalorder %s746_s7, %s742_s6 }
   0xa   : > { %s1047_s14 = smov (%p31_p0, %s29_s14), 0  ;;  %p52_p5 = scmp.eq.s32.totalorder %s505_s12, 0 }
   0xb   : > { %p819_p4 = por %p46_p2, %p45_p1  ;;  %s35_s17 = ssub.s32 %s758_s10, %s1047_s14 }
   0xc   : > { %p75_p6 = scmp.eq.s32.totalorder %s505_s12, 1  ;;  %p36_p7 = scmp.eq.s32.totalorder %s35_s17, 0 }
   0xd   : > { %p825_p8 = por %p52_p5, %p51_p3  ;;  %p81_p10 = scmp.eq.s32.totalorder %s506_s13, 1 }
   0xe   : > { %p829_p9 = por %p75_p6, %p45_p1  ;;  %p533_p13 = scmp.lt.s32.totalorder %s762_s11, 2 }
   0xf   : > { %s834_s20 = scalar_select %p36_p7, %s750_s8, %s38_s15  }
  0x10   : > { %s1033_s19 = scalar_select %p829_p9, 1, 0 }
  0x11   : > { %p836_p11 = por %p81_p10, %p51_p3  ;;  %s101_s22 = sand.u32 1, %s750_s8  }
  0x12   : > { %s509_s23 = sshll.u32 %s101_s22, 3  ;;  %s510_s24 = sshll.u32 %s758_s10, 7 }
  0x13   : > { %s1034_s21 = scalar_select %p836_p11, 1, 0 }
  0x14   : > { %s847_s27 = scalar_lea.hbm %s1028_s0, %s510_s24  ;;  %s105_s28 = scalar_lea.vmem [#allocation2], %s509_s23 }
  0x15   : > { %s113_s29 = sshll.u32 %s105_s28, 4  ;;  %p853_p0 = pnand %p533_p13, %p819_p4  ;;  %s849_s29 = int_to_ptr.vmem [resolvable:$true] %s113_s29 }
  0x16   : > { %s102_s2 = scalar_lea.sflag [#allocation3], %s101_s22  ;;  %s650_s3 = scalar_lea.hbm %s847_s27, 128 }
  0x17   : > { %p651_p3 = scmp.ne.s32.totalorder %s847_s27, %s650_s3  ;;  %p652_p5 = pneg %p853_p0 }
  0x18   : > { %s655_s12 = scalar_lea.hbm %s1028_s0, 256  ;;  %p656_p4 = scmp.lt.u32.totalorder %s847_s27, %s1028_s0 }
  0x19   : > { %p653_p6 = pnand %p652_p5, %p651_p3  ;;  %p657_p10 = scmp.lt.u32.totalorder %s655_s12, %s650_s3 }
  0x1a   : > { %p659_p12 = scmp.lt.u32.totalorder %s650_s3, %s847_s27 }
  0x1b   : > { %p654_p7 = pneg %p653_p6  ;;  %p658_p13 = por %p657_p10, %p656_p4 }
  0x1d   : > { %p660_p1 = por %p659_p12, %p658_p13 }
  0x1f   : > { %p661_p2 = pnand %p660_p1, %p654_p7 }
  0x21   : > { %664 = shalt.err (!%p661_p2)
}
  0x22   : > { %s665_s16 = scalar_lea.vmem %s849_s29, 128  ;;  %s764_s17 = smov [#allocation2]  }
  0x23   : > { %p666_p3 = scmp.ne.s32.totalorder %s849_s29, %s665_s16  ;;  %s670_s22 = sshll.u32 %s764_s17, 4  ;;  %s671_s22 = int_to_ptr.vmem [resolvable:$false] %s670_s22 }
  0x24   : > { %s672_s23 = scalar_lea.vmem %s671_s22, 256  ;;  %p673_p9 = scmp.lt.s32.totalorder %s849_s29, %s671_s22 }
  0x25   : > { %p668_p6 = pnand %p666_p3, %p652_p5  ;;  %p674_p4 = scmp.lt.s32.totalorder %s672_s23, %s665_s16 }
  0x27   : > { %p669_p11 = pneg %p668_p6  ;;  %p675_p10 = por %p674_p4, %p673_p9 }
  0x29   : > { %p676_p12 = pnand %p675_p10, %p669_p11 }
  0x2b   : > { %679 = shalt.err (!%p676_p12)
}
  0x2c   : > { %528 = dma.hbm_to_vmem [thread:$0]  (!%p853_p0), %s847_s27, 128, %s849_s29, %s102_s2  }
  0x2d   : > { %p1036_p1 = scmp.lt.s32.totalorder %s762_s11, 3  ;;  %p1037_p2 = scmp.ge.s32.totalorder %s762_s11, 1 }
  0x2f   : > { %p119_p5 = pnand %p1037_p2, %p1036_p1 }
  0x30   : > { %s889_s24 = sand.u32 (!%p119_p5), 1, %s746_s7  }
  0x31   : > { %122 = sbr.rel (%p119_p5) target bundleno = 149 (0x95), region = 24  ;;  %s512_s25 = sshll.u32 (!%p119_p5), %s889_s24, 3 }
  0x32   : > { %s125_s26 = scalar_lea.sflag (!%p119_p5), [#allocation3], %s889_s24  ;;  %s128_s28 = scalar_lea.vmem (!%p119_p5), [#allocation2], %s512_s25 }
  0x38   : > { %733 = dma.done.wait (%p825_p8), %s125_s26, 128  }
  0x39   : > { %735 = vsyncadd (%p825_p8), %s125_s26, 4294967168  ;;  %v157_v0 = vlaneseq  ;;  %v178_v7 = vld [vmem:[%s128_s28] sm:$0xff]  ;;  %s513_s18 = sshll.u32 %s889_s24, 5  ;;  %s520_s29 = sshll.u32 %s754_s9, 9 }
  0x3a   : > { %v514_v12 = vadd.f32 -0.5, %v178_v7  ;;  %s956_s27 = scalar_lea.vmem [#allocation5], %s513_s18  ;;  %s976_s4 = scalar_lea.hbm %s1029_s1, %s520_s29 }
  0x3b   : > { %v158_v1 = vshrl.u32 %v157_v0, 7  ;;  %s423_s30 = sshll.u32 %s956_s27, 4  ;;  %s410_s5 = scalar_lea.sflag [#allocation4], %s889_s24  ;;  %s978_s30 = int_to_ptr.vmem [resolvable:$true] %s423_s30 }
  0x3c   : > { %v180_v21 = vmul.f32 14.142136, %v514_v12  ;;  %s680_s12 = scalar_lea.vmem %s978_s30, 512  ;;  %p1038_p9 = scmp.ne.s32.totalorder %s1033_s19, 0 }
  0x3d   : > { %v162_v2 = vcvt.s32.f32 %v158_v1  ;;  %v183_v4 = vsub.s32 0, %v158_v1  ;;  %v159_v5 = vadd.s32 8, %v158_v1  ;;  %v160_v6 = vadd.s32 16, %v158_v1  ;;  %p681_p8 = scmp.ne.s32.totalorder %s978_s30, %s680_s12  ;;  %s765_s9 = smov [#allocation5]  }
  0x3e   : > { %v211_v8 = vsub.s32 1, %v158_v1  ;;  %v239_v9 = vsub.s32 2, %v158_v1  ;;  %v267_v10 = vsub.s32 3, %v158_v1  ;;  %v161_v11 = vadd.s32 24, %v158_v1  ;;  %s684_s13 = sshll.u32 %s765_s9, 4  ;;  %s685_s13 = int_to_ptr.vmem [resolvable:$false] %s684_s13 }
  0x3f   : > { %v166_v3 = vmul.f32 0.44194174, %v162_v2  ;;  %v295_v13 = vsub.s32 4, %v158_v1  ;;  %v163_v14 = vcvt.s32.f32 %v159_v5  ;;  %v164_v15 = vcvt.s32.f32 %v160_v6  ;;  %p682_p11 = pnand %p681_p8, %p1038_p9  ;;  %s686_s15 = scalar_lea.vmem %s685_s13, 1024 }
  0x40   : > { %v323_v16 = vsub.s32 5, %v158_v1  ;;  %v351_v17 = vsub.s32 6, %v158_v1  ;;  %v379_v18 = vsub.s32 7, %v158_v1  ;;  %v165_v19 = vcvt.s32.f32 %v161_v11  ;;  %p687_p7 = scmp.lt.s32.totalorder %s978_s30, %s685_s13  ;;  %p688_p13 = scmp.lt.s32.totalorder %s686_s15, %s680_s12 }
  0x41   : > { %v170_v20 = vadd.f32 -6.850097, %v166_v3  ;;  %v167_v22 = vmul.f32 0.44194174, %v163_v14  ;;  %v168_v23 = vmul.f32 0.44194174, %v164_v15  ;;  %v897_v25 = vrot.slane %v180_v21, %v183_v4  ;;  %p683_p0 = pneg %p682_p11 }
  0x42   : > { %v169_v24 = vmul.f32 0.44194174, %v165_v19  ;;  %v899_v26 = vrot.slane %v180_v21, %v211_v8  ;;  %v901_v27 = vrot.slane %v180_v21, %v239_v9  ;;  %v903_v28 = vrot.slane %v180_v21, %v267_v10  ;;  %p689_p3 = por %p688_p13, %p687_p7 }
  0x43   : > { %v905_v29 = vrot.slane %v180_v21, %v295_v13  ;;  %v907_v30 = vrot.slane %v180_v21, %v323_v16  ;;  %v909_v31 = vrot.slane %v180_v21, %v351_v17  ;;  %v911_v32 = vrot.slane %v180_v21, %v379_v18 }
  0x44   : > { %v185_v33 = vsub.f32 %v897_v25, %v170_v20  ;;  %v213_v34 = vsub.f32 %v899_v26, %v170_v20  ;;  %v241_v35 = vsub.f32 %v901_v27, %v170_v20  ;;  %v269_v36 = vsub.f32 %v903_v28, %v170_v20  ;;  %p690_p6 = pnand %p689_p3, %p683_p0 }
  0x45   : > { %v297_v37 = vsub.f32 %v905_v29, %v170_v20  ;;  %v325_v38 = vsub.f32 %v907_v30, %v170_v20  ;;  %v353_v39 = vsub.f32 %v909_v31, %v170_v20  ;;  %v381_v40 = vsub.f32 %v911_v32, %v170_v20 }
  0x46   : > { %v189_v41 = vmul.f32 %v185_v33, %v185_v33  ;;  %v217_v42 = vmul.f32 %v213_v34, %v213_v34  ;;  %v245_v43 = vmul.f32 %v241_v35, %v241_v35  ;;  %v273_v44 = vmul.f32 %v269_v36, %v269_v36 }
  0x47   : > { %v301_v45 = vmul.f32 %v297_v37, %v297_v37  ;;  %v329_v46 = vmul.f32 %v325_v38, %v325_v38  ;;  %v357_v47 = vmul.f32 %v353_v39, %v353_v39  ;;  %v385_v48 = vmul.f32 %v381_v40, %v381_v40 }
  0x48   : > { %v193_v49 = vsub.f32 0.0, %v189_v41  ;;  %v221_v50 = vsub.f32 0.0, %v217_v42  ;;  %v249_v51 = vsub.f32 0.0, %v245_v43  ;;  %v277_v52 = vsub.f32 0.0, %v273_v44 }
  0x49   : > { %v305_v53 = vsub.f32 0.0, %v301_v45  ;;  %v333_v54 = vsub.f32 0.0, %v329_v46  ;;  %v361_v55 = vsub.f32 0.0, %v357_v47  ;;  %v389_v56 = vsub.f32 0.0, %v385_v48 }
  0x4a   : > { %v197_v57 = vmul.f32 1.442695, %v193_v49  ;;  %v225_v58 = vmul.f32 1.442695, %v221_v50  ;;  %v253_v59 = vmul.f32 1.442695, %v249_v51 }
  0x4b   : > { %v281_v60 = vmul.f32 1.442695, %v277_v52  ;;  %v309_v61 = vmul.f32 1.442695, %v305_v53  ;;  %v337_v62 = vmul.f32 1.442695, %v333_v54 }
  0x4c   : > { %586 = vpow2.f32 %v197_v57  ;;  %v365_v63 = vmul.f32 1.442695, %v361_v55  ;;  %v171_v0 = vadd.f32 -6.850097, %v167_v22  ;;  %v393_v1 = vmul.f32 1.442695, %v389_v56 }
  0x4d   : > { %588 = vpow2.f32 %v225_v58  ;;  %v921_v2 = vadd.f32 -6.850097, %v168_v23  ;;  %v923_v3 = vadd.f32 -6.850097, %v169_v24 }
  0x4e   : > { %590 = vpow2.f32 %v253_v59  ;;  %v186_v4 = vsub.f32 %v897_v25, %v171_v0  ;;  %v214_v5 = vsub.f32 %v899_v26, %v171_v0  ;;  %v242_v6 = vsub.f32 %v901_v27, %v171_v0 }
  0x4f   : > { %592 = vpow2.f32 %v281_v60  ;;  %v270_v7 = vsub.f32 %v903_v28, %v171_v0  ;;  %v298_v8 = vsub.f32 %v905_v29, %v171_v0  ;;  %v326_v9 = vsub.f32 %v907_v30, %v171_v0 }
  0x50   : > { %594 = vpow2.f32 %v309_v61  ;;  %v190_v10 = vmul.f32 %v186_v4, %v186_v4  ;;  %v218_v11 = vmul.f32 %v214_v5, %v214_v5  ;;  %v246_v12 = vmul.f32 %v242_v6, %v242_v6 }
  0x51   : > { %596 = vpow2.f32 %v337_v62  ;;  %v274_v13 = vmul.f32 %v270_v7, %v270_v7  ;;  %v302_v14 = vmul.f32 %v298_v8, %v298_v8  ;;  %v330_v15 = vmul.f32 %v326_v9, %v326_v9 }
  0x52   : > { %598 = vpow2.f32 %v365_v63  ;;  %v194_v16 = vsub.f32 0.0, %v190_v10  ;;  %v222_v17 = vsub.f32 0.0, %v218_v11  ;;  %v250_v18 = vsub.f32 0.0, %v246_v12 }
  0x53   : > { %600 = vpow2.f32 %v393_v1  ;;  %v278_v19 = vsub.f32 0.0, %v274_v13  ;;  %v306_v20 = vsub.f32 0.0, %v302_v14  ;;  %v334_v21 = vsub.f32 0.0, %v330_v15 }
  0x54   : > { %v199_v22 = vmul.f32 1.442695, %v194_v16  ;;  %v227_v23 = vmul.f32 1.442695, %v222_v17  ;;  %v255_v24 = vmul.f32 1.442695, %v250_v18  ;;  %v354_v33 = vsub.f32 %v909_v31, %v171_v0 }
  0x55   : > { %v283_v34 = vmul.f32 1.442695, %v278_v19  ;;  %v311_v35 = vmul.f32 1.442695, %v306_v20  ;;  %v339_v36 = vmul.f32 1.442695, %v334_v21  ;;  %v382_v37 = vsub.f32 %v911_v32, %v171_v0 }
  0x56   : > { %v587_v38 = vpop.eup %586  ;;  %602 = vpow2.f32 %v199_v22  ;;  %v358_v39 = vmul.f32 %v354_v33, %v354_v33  ;;  %v187_v40 = vsub.f32 %v897_v25, %v921_v2  ;;  %v215_v41 = vsub.f32 %v899_v26, %v921_v2 }
  0x57   : > { %v589_v42 = vpop.eup %588  ;;  %604 = vpow2.f32 %v227_v23  ;;  %v386_v43 = vmul.f32 %v382_v37, %v382_v37  ;;  %v243_v44 = vsub.f32 %v901_v27, %v921_v2  ;;  %v271_v0 = vsub.f32 %v903_v28, %v921_v2 }
  0x58   : > { %v591_v45 = vpop.eup %590  ;;  %606 = vpow2.f32 %v255_v24  ;;  %v362_v46 = vsub.f32 0.0, %v358_v39  ;;  %v191_v47 = vmul.f32 %v187_v40, %v187_v40  ;;  %v219_v48 = vmul.f32 %v215_v41, %v215_v41 }
  0x59   : > { %v593_v49 = vpop.eup %592  ;;  %v233_v50 = vadd.f32 %v589_v42, %v587_v38  ;;  %608 = vpow2.f32 %v283_v34  ;;  %v390_v51 = vsub.f32 0.0, %v386_v43  ;;  %v247_v52 = vmul.f32 %v243_v44, %v243_v44 }
  0x5a   : > { %v595_v53 = vpop.eup %594  ;;  %610 = vpow2.f32 %v311_v35  ;;  %v367_v54 = vmul.f32 1.442695, %v362_v46  ;;  %v195_v55 = vsub.f32 0.0, %v191_v47  ;;  %v223_v56 = vsub.f32 0.0, %v219_v48 }
  0x5b   : > { %v597_v57 = vpop.eup %596  ;;  %v261_v58 = vadd.f32 %v591_v45, %v233_v50  ;;  %612 = vpow2.f32 %v339_v36  ;;  %v395_v59 = vmul.f32 1.442695, %v390_v51  ;;  %v251_v60 = vsub.f32 0.0, %v247_v52 }
  0x5c   : > { %v599_v61 = vpop.eup %598  ;;  %614 = vpow2.f32 %v367_v54  ;;  %v201_v62 = vmul.f32 1.442695, %v195_v55  ;;  %v229_v63 = vmul.f32 1.442695, %v223_v56  ;;  %v299_v6 = vsub.f32 %v905_v29, %v921_v2 }
  0x5d   : > { %v601_v1 = vpop.eup %600  ;;  %v289_v4 = vadd.f32 %v593_v49, %v261_v58  ;;  %616 = vpow2.f32 %v395_v59  ;;  %v257_v5 = vmul.f32 1.442695, %v251_v60  ;;  %v275_v7 = vmul.f32 %v271_v0, %v271_v0 }
  0x5e   : > { %618 = vpow2.f32 %v201_v62  ;;  %v327_v8 = vsub.f32 %v907_v30, %v921_v2  ;;  %v355_v9 = vsub.f32 %v909_v31, %v921_v2  ;;  %v303_v11 = vmul.f32 %v299_v6, %v299_v6 }
  0x5f   : > { %v317_v10 = vadd.f32 %v595_v53, %v289_v4  ;;  %620 = vpow2.f32 %v229_v63  ;;  %v383_v12 = vsub.f32 %v911_v32, %v921_v2  ;;  %v279_v14 = vsub.f32 0.0, %v275_v7 }
  0x60   : > { %v603_v13 = vpop.eup %602  ;;  %622 = vpow2.f32 %v257_v5  ;;  %v331_v15 = vmul.f32 %v327_v8, %v327_v8  ;;  %v359_v16 = vmul.f32 %v355_v9, %v355_v9  ;;  %v307_v19 = vsub.f32 0.0, %v303_v11 }
  0x61   : > { %v605_v17 = vpop.eup %604  ;;  %v345_v18 = vadd.f32 %v597_v57, %v317_v10  ;;  %v387_v20 = vmul.f32 %v383_v12, %v383_v12  ;;  %v285_v22 = vmul.f32 1.442695, %v279_v14  ;;  %v188_v33 = vsub.f32 %v897_v25, %v923_v3 }
  0x62   : > { %v607_v21 = vpop.eup %606  ;;  %v335_v23 = vsub.f32 0.0, %v331_v15  ;;  %v363_v24 = vsub.f32 0.0, %v359_v16  ;;  %v234_v2 = vadd.f32 %v605_v17, %v603_v13  ;;  %v313_v36 = vmul.f32 1.442695, %v307_v19 }
  0x63   : > { %v609_v34 = vpop.eup %608  ;;  %v373_v35 = vadd.f32 %v599_v61, %v345_v18  ;;  %v391_v37 = vsub.f32 0.0, %v387_v20  ;;  %624 = vpow2.f32 %v285_v22  ;;  %v192_v41 = vmul.f32 %v188_v33, %v188_v33 }
  0x64   : > { %v611_v38 = vpop.eup %610  ;;  %v341_v39 = vmul.f32 1.442695, %v335_v23  ;;  %v369_v40 = vmul.f32 1.442695, %v363_v24  ;;  %v262_v44 = vadd.f32 %v607_v21, %v234_v2  ;;  %626 = vpow2.f32 %v313_v36 }
  0x65   : > { %v613_v42 = vpop.eup %612  ;;  %v401_v43 = vadd.f32 %v601_v1, %v373_v35  ;;  %v397_v45 = vmul.f32 1.442695, %v391_v37  ;;  %v196_v47 = vsub.f32 0.0, %v192_v41  ;;  %v216_v25 = vsub.f32 %v899_v26, %v923_v3 }
  0x66   : > { %v615_v46 = vpop.eup %614  ;;  %628 = vpow2.f32 %v341_v39  ;;  %v244_v48 = vsub.f32 %v901_v27, %v923_v3  ;;  %v290_v50 = vadd.f32 %v609_v34, %v262_v44  ;;  %v272_v51 = vsub.f32 %v903_v28, %v923_v3 }
  0x67   : > { %v617_v49 = vpop.eup %616  ;;  %405 = vst [vmem:[%s956_s27] sm:$0xff] %v401_v43  ;;  %630 = vpow2.f32 %v369_v40  ;;  %v300_v52 = vsub.f32 %v905_v29, %v923_v3  ;;  %v203_v54 = vmul.f32 1.442695, %v196_v47  ;;  %v220_v26 = vmul.f32 %v216_v25, %v216_v25 }
  0x68   : > { %v619_v53 = vpop.eup %618  ;;  %632 = vpow2.f32 %v397_v45  ;;  %v248_v55 = vmul.f32 %v244_v48, %v244_v48  ;;  %v318_v27 = vadd.f32 %v611_v38, %v290_v50  ;;  %v276_v57 = vmul.f32 %v272_v51, %v272_v51 }
  0x69   : > { %v621_v56 = vpop.eup %620  ;;  %v304_v58 = vmul.f32 %v300_v52, %v300_v52  ;;  %634 = vpow2.f32 %v203_v54  ;;  %v224_v60 = vsub.f32 0.0, %v220_v26  ;;  %v328_v62 = vsub.f32 %v907_v30, %v923_v3 }
  0x6a   : > { %v623_v59 = vpop.eup %622  ;;  %v252_v61 = vsub.f32 0.0, %v248_v55  ;;  %v346_v28 = vadd.f32 %v613_v42, %v318_v27  ;;  %v235_v63 = vadd.f32 %v621_v56, %v619_v53  ;;  %v280_v0 = vsub.f32 0.0, %v276_v57 }
  0x6b   : > { %v308_v29 = vsub.f32 0.0, %v304_v58  ;;  %v231_v1 = vmul.f32 1.442695, %v224_v60  ;;  %v332_v5 = vmul.f32 %v328_v62, %v328_v62  ;;  %v356_v6 = vsub.f32 %v909_v31, %v923_v3 }
  0x6c   : > { %v259_v4 = vmul.f32 1.442695, %v252_v61  ;;  %v374_v7 = vadd.f32 %v615_v46, %v346_v28  ;;  %v263_v8 = vadd.f32 %v623_v59, %v235_v63  ;;  %v287_v9 = vmul.f32 1.442695, %v280_v0 }
  0x6d   : > { %v315_v10 = vmul.f32 1.442695, %v308_v29  ;;  %v625_v11 = vpop.eup %624  ;;  %636 = vpow2.f32 %v231_v1  ;;  %v336_v12 = vsub.f32 0.0, %v332_v5  ;;  %v360_v13 = vmul.f32 %v356_v6, %v356_v6 }
  0x6e   : > { %v384_v30 = vsub.f32 %v911_v32, %v923_v3  ;;  %v627_v14 = vpop.eup %626  ;;  %v402_v15 = vadd.f32 %v617_v49, %v374_v7  ;;  %v291_v16 = vadd.f32 %v625_v11, %v263_v8  ;;  %638 = vpow2.f32 %v259_v4 }
  0x6f   : > { %640 = vpow2.f32 %v287_v9  ;;  %v343_v18 = vmul.f32 1.442695, %v336_v12  ;;  %v364_v31 = vsub.f32 0.0, %v360_v13 }
  0x70   : > { %v629_v17 = vpop.eup %628  ;;  %v388_v19 = vmul.f32 %v384_v30, %v384_v30  ;;  %406 = vst [vmem:[%s956_s27 + $0x8] sm:$0xff] %v402_v15  ;;  %v319_v21 = vadd.f32 %v627_v14, %v291_v16  ;;  %642 = vpow2.f32 %v315_v10 }
  0x71   : > { %v631_v20 = vpop.eup %630  ;;  %v371_v23 = vmul.f32 1.442695, %v364_v31  ;;  %644 = vpow2.f32 %v343_v18 }
  0x72   : > { %v633_v22 = vpop.eup %632  ;;  %v392_v24 = vsub.f32 0.0, %v388_v19  ;;  %v347_v33 = vadd.f32 %v629_v17, %v319_v21 }
  0x73   : > { %v635_v34 = vpop.eup %634  ;;  %646 = vpow2.f32 %v371_v23 }
  0x74   : > { %v399_v32 = vmul.f32 1.442695, %v392_v24  ;;  %v375_v3 = vadd.f32 %v631_v20, %v347_v33 }
  0x76   : > { %v403_v35 = vadd.f32 %v633_v22, %v375_v3  ;;  %648 = vpow2.f32 %v399_v32 }
  0x77   : > { %v637_v2 = vpop.eup %636 }
  0x78   : > { %v639_v36 = vpop.eup %638  ;;  %407 = vst [vmem:[%s956_s27 + $0x10] sm:$0xff] %v403_v35  ;;  %v236_v37 = vadd.f32 %v637_v2, %v635_v34 }
  0x79   : > { %v641_v38 = vpop.eup %640 }
  0x7a   : > { %v264_v39 = vadd.f32 %v639_v36, %v236_v37  ;;  %v643_v40 = vpop.eup %642 }
  0x7b   : > { %v645_v42 = vpop.eup %644 }
  0x7c   : > { %v292_v41 = vadd.f32 %v641_v38, %v264_v39 }
  0x7d   : > { %v647_v44 = vpop.eup %646 }
  0x7e   : > { %v320_v43 = vadd.f32 %v643_v40, %v292_v41 }
  0x80   : > { %v348_v45 = vadd.f32 %v645_v42, %v320_v43  ;;  %v649_v46 = vpop.eup %648 }
  0x82   : > { %v376_v47 = vadd.f32 %v647_v44, %v348_v45 }
  0x84   : > { %v404_v25 = vadd.f32 %v649_v46, %v376_v47 }
  0x86   : > { %408 = vst [vmem:[%s956_s27 + $0x18] sm:$0xff] %v404_v25 }
  0x87   : > { %693 = shalt.err (!%p690_p6)
}
  0x88   : > { %s694_s16 = scalar_lea.hbm %s976_s4, 512  ;;  %s698_s23 = scalar_lea.hbm %s1029_s1, 1024 }
  0x89   : > { %p695_p4 = scmp.ne.s32.totalorder %s976_s4, %s694_s16  ;;  %p699_p1 = scmp.lt.u32.totalorder %s976_s4, %s1029_s1 }
  0x8a   : > { %p700_p2 = scmp.lt.u32.totalorder %s698_s23, %s694_s16  ;;  %p702_p8 = scmp.lt.u32.totalorder %s694_s16, %s976_s4 }
  0x8b   : > { %p696_p10 = pnand %p695_p4, %p1038_p9 }
  0x8c   : > { %p701_p5 = por %p700_p2, %p699_p1 }
  0x8d   : > { %p697_p12 = pneg %p696_p10 }
  0x8e   : > { %p703_p11 = por %p702_p8, %p701_p5 }
  0x90   : > { %p704_p0 = pnand %p703_p11, %p697_p12 }
  0x92   : > { %707 = shalt.err (!%p704_p0)
}
  0x93   : > { %s766_s28 = smov 128   ;;  %s767_s18 = smov 8  }
  0x94   : > { %523 = dma.vmem_to_hbm [thread:$0]  (%p1038_p9), %s978_s30, 512, %s976_s4, %s410_s5, %s766_s28, %s766_s28, %s767_s18  }
  0x95 PF: > { %s438_s27 = sand.u32 1, %s742_s6   ;;  %p1039_p7 = scmp.ne.s32.totalorder %s1034_s21, 0 }
  0x96   : > { %p1040_p13 = scmp.ge.s32.totalorder %s762_s11, 2  ;;  %s439_s29 = scalar_lea.sflag [#allocation4], %s438_s27 }
  0x98   : > { %p530_p3 = pnand %p1040_p13, %p1039_p7 }
  0x9a   : > { %737 = dma.done.wait (!%p530_p3), %s439_s29, 512  }
  0x9b   : > { %739 = vsyncadd (!%p530_p3), %s439_s29, 4294966784  ;;  %s17_s11 = sadd.s32 1, %s762_s11   ;;  %s1041_s6 = smov %s746_s7 }
  0x9c   : > { %p14_p6 = scmp.ge.s32.totalorder %s17_s11, 4   ;;  %s1042_s7 = smov %s750_s8 }
  0x9d   : > { %s1043_s8 = smov %s834_s20  ;;  %s1044_s9 = smov %s758_s10 }
  0x9e   : > { %s1045_s10 = smov %s1047_s14  ;;  %16 = sbr.rel (!%p14_p6) target bundleno = 6 (0x6), region = 73 }
  0xa5   :  { %444 = vsyncpa [#allocation3], 1 }
  0xa6   :  { %446 = vsyncpa [#allocation3 + $0x1], 1 }
  0xa7   :  { %447 = vsyncpa [#allocation4], 1 }
  0xa8   :  { %449 = vsyncpa [#allocation4 + $0x1], 1 }

</bundles_post_ra>
